<compile_context>
chip_gen: v6e
topology: v6e:2x2x1
jax: 0.10.0
libtpu: 0.0.40
codegen_flags: <defaults>
</compile_context>

<pallas_src>
import jax
import jax.numpy as jnp
from jax.experimental import pallas as pl
from jax.experimental.pallas import tpu as pltpu


def _priornet_kernel(x_ref, w1_ref, b1_ref, w2_ref, b2_ref, o_ref):
    # hidden = relu(x @ W1 + b1)
    h = jnp.dot(x_ref[...], w1_ref[...], preferred_element_type=jnp.float32)
    h = jnp.maximum(h + b1_ref[...], 0.0)          # (1, H) bias broadcasts over batch
    # logits = hidden @ W2 + b2
    out = jnp.dot(h, w2_ref[...], preferred_element_type=jnp.float32)
    out = out + b2_ref[...]                        # (1, out) bias broadcasts over batch
    o_ref[...] = out.astype(o_ref.dtype)


def priornet_forward_small(x, w1, b1, w2, b2):
    """Gridless path: single kernel invocation, whole arrays in VMEM."""
    B = x.shape[0]
    out_dim = w2.shape[1]
    vmem_spec = pl.BlockSpec(memory_space=pltpu.MemorySpace.VMEM)
    return pl.pallas_call(
        _priornet_kernel,
        out_shape=jax.ShapeDtypeStruct((B, out_dim), jnp.float32),
        in_specs=[vmem_spec] * 5,
        out_specs=vmem_spec,
    )(x, w1, b1, w2, b2)


def _round_up(n, m):
    return ((n + m - 1) // m) * m


def priornet_forward_batched(x, w1, b1, w2, b2, *, batch_tile=256):
    """Batch-tiled path: grid over batch, weights resident, lane-dense output."""
    B, input_dim = x.shape
    hidden_dim = w1.shape[1]
    out_dim = w2.shape[1]

    # Lane-pad hidden and output dims to multiples of 128 (zero padding keeps
    # the math identical; padded output columns are sliced off below).
    hidden_pad = _round_up(hidden_dim, 128)
    out_pad = _round_up(out_dim, 128)
    w1p = jnp.pad(w1, ((0, 0), (0, hidden_pad - hidden_dim)))
    b1p = jnp.pad(b1, ((0, 0), (0, hidden_pad - hidden_dim)))
    w2p = jnp.pad(w2, ((0, hidden_pad - hidden_dim), (0, out_pad - out_dim)))
    b2p = jnp.pad(b2, ((0, 0), (0, out_pad - out_dim)))

    # Pad batch to a multiple of the batch tile (extra rows sliced off below).
    Bp = _round_up(B, batch_tile)
    xp = jnp.pad(x, ((0, Bp - B), (0, 0)))

    out = pl.pallas_call(
        _priornet_kernel,
        out_shape=jax.ShapeDtypeStruct((Bp, out_pad), jnp.float32),
        grid=(Bp // batch_tile,),
        in_specs=[
            pl.BlockSpec((batch_tile, input_dim), lambda i: (i, 0)),   # x tile
            pl.BlockSpec((input_dim, hidden_pad), lambda i: (0, 0)),   # W1 (resident)
            pl.BlockSpec((1, hidden_pad), lambda i: (0, 0)),           # b1 (resident)
            pl.BlockSpec((hidden_pad, out_pad), lambda i: (0, 0)),     # W2 (resident)
            pl.BlockSpec((1, out_pad), lambda i: (0, 0)),              # b2 (resident)
        ],
        out_specs=pl.BlockSpec((batch_tile, out_pad), lambda i: (i, 0)),
        compiler_params=pltpu.CompilerParams(
            dimension_semantics=("parallel",),   # v7x: shard batch tiles over both TCs
        ),
    )(xp, w1p, b1p, w2p, b2p)
    return out[:B, :out_dim]


def priornet_forward(x, w1, b1, w2, b2, *, batch_tile=256):
    """PriorNet.forward: relu(x @ W1 + b1) @ W2 + b2."""
    if x.shape[0] <= batch_tile:
        return priornet_forward_small(x, w1, b1, w2, b2)
    return priornet_forward_batched(x, w1, b1, w2, b2, batch_tile=batch_tile)


def init_priornet_params(key, input_dim, hidden_dim, out_dim=3):
    """Deterministic init mimicking torch.nn.Linear default (U[-1/sqrt(fan_in), 1/sqrt(fan_in)])."""
    k1, k2, k3, k4 = jax.random.split(key, 4)
    bound1 = 1.0 / jnp.sqrt(jnp.float32(input_dim))
    bound2 = 1.0 / jnp.sqrt(jnp.float32(hidden_dim))
    w1 = jax.random.uniform(k1, (input_dim, hidden_dim), jnp.float32, -bound1, bound1)
    b1 = jax.random.uniform(k2, (1, hidden_dim), jnp.float32, -bound1, bound1)
    w2 = jax.random.uniform(k3, (hidden_dim, out_dim), jnp.float32, -bound2, bound2)
    b2 = jax.random.uniform(k4, (1, out_dim), jnp.float32, -bound2, bound2)
    return w1, b1, w2, b2


# TODO(synk): predict_alpha / predict_dir / fit / mutual_information etc. use
# Dirichlet distributions, KL divergence and a training loop — host-side logic,
# not part of the forward pass, so not implemented as kernels.

if __name__ == "__main__":
    key = jax.random.PRNGKey(0)
    k_x, k_p, k_xb = jax.random.split(key, 3)

    batch, input_dim, hidden_dim, out_dim = 8, 4, 32, 3
    x = jax.random.normal(k_x, (batch, input_dim), jnp.float32)
    w1, b1, w2, b2 = init_priornet_params(k_p, input_dim, hidden_dim, out_dim)

    def ref_fwd(xx):
        return jnp.maximum(xx @ w1 + b1, 0.0) @ w2 + b2

    # Small-batch (gridless) path.
    out_small = jax.block_until_ready(priornet_forward(x, w1, b1, w2, b2))
    assert out_small.shape == (batch, out_dim)
    assert jnp.allclose(out_small, ref_fwd(x), atol=1e-5, rtol=1e-5)

    # Batch-tiled path (still cheap: 512 x 4 f32).
    big_batch = 512
    xb = jax.random.normal(k_xb, (big_batch, input_dim), jnp.float32)
    out_big = jax.block_until_ready(
        priornet_forward(xb, w1, b1, w2, b2, batch_tile=256))
    assert out_big.shape == (big_batch, out_dim)
    assert jnp.allclose(out_big, ref_fwd(xb), atol=1e-5, rtol=1e-5)

    print("KERNEL_OK")
</pallas_src>

<mosaic_0001>
module attributes {stable_mosaic.version = 11 : i64} {
  func.func @_priornet_kernel(%arg0: memref<8x4xf32, #tpu.memory_space<vmem>>, %arg1: memref<4x32xf32, #tpu.memory_space<vmem>>, %arg2: memref<1x32xf32, #tpu.memory_space<vmem>>, %arg3: memref<32x3xf32, #tpu.memory_space<vmem>>, %arg4: memref<1x3xf32, #tpu.memory_space<vmem>>, %arg5: memref<8x3xf32, #tpu.memory_space<vmem>>) attributes {dimension_semantics = [], scalar_prefetch = 0 : i64, scratch_operands = 0 : i64, tpu.core_type = #tpu.core_type<tc>} {
    %c0 = arith.constant 0 : index
    %c0_0 = arith.constant 0 : index
    %0 = vector.load %arg0[%c0, %c0_0] : memref<8x4xf32, #tpu.memory_space<vmem>>, vector<8x4xf32>
    %c0_1 = arith.constant 0 : index
    %c0_2 = arith.constant 0 : index
    %1 = vector.load %arg1[%c0_1, %c0_2] : memref<4x32xf32, #tpu.memory_space<vmem>>, vector<4x32xf32>
    %cst = arith.constant dense<0.000000e+00> : vector<8x32xf32>
    %2 = tpu.matmul %0, %1, %cst {dimension_numbers = #tpu.dot_dimension_numbers<[1], [0], [0], [1], [0, 0, 1, 1], [], []>} : vector<8x4xf32>, vector<4x32xf32>, vector<8x32xf32> -> vector<8x32xf32>
    %c0_3 = arith.constant 0 : index
    %c0_4 = arith.constant 0 : index
    %3 = vector.load %arg2[%c0_3, %c0_4] : memref<1x32xf32, #tpu.memory_space<vmem>>, vector<1x32xf32>
    %4 = vector.broadcast %3 : vector<1x32xf32> to vector<8x32xf32>
    %5 = arith.addf %2, %4 : vector<8x32xf32>
    %cst_5 = arith.constant 0.000000e+00 : f32
    %6 = vector.broadcast %cst_5 : f32 to vector<8x32xf32>
    %7 = arith.maximumf %5, %6 : vector<8x32xf32>
    %c0_6 = arith.constant 0 : index
    %c0_7 = arith.constant 0 : index
    %8 = vector.load %arg3[%c0_6, %c0_7] : memref<32x3xf32, #tpu.memory_space<vmem>>, vector<32x3xf32>
    %cst_8 = arith.constant dense<0.000000e+00> : vector<8x3xf32>
    %9 = tpu.matmul %7, %8, %cst_8 {dimension_numbers = #tpu.dot_dimension_numbers<[1], [0], [0], [1], [0, 0, 1, 1], [], []>} : vector<8x32xf32>, vector<32x3xf32>, vector<8x3xf32> -> vector<8x3xf32>
    %c0_9 = arith.constant 0 : index
    %c0_10 = arith.constant 0 : index
    %10 = vector.load %arg4[%c0_9, %c0_10] : memref<1x3xf32, #tpu.memory_space<vmem>>, vector<1x3xf32>
    %11 = vector.broadcast %10 : vector<1x3xf32> to vector<8x3xf32>
    %12 = arith.addf %9, %11 : vector<8x3xf32>
    %c0_11 = arith.constant 0 : index
    %c0_12 = arith.constant 0 : index
    %13 = vector.load %arg5[%c0_11, %c0_12] : memref<8x3xf32, #tpu.memory_space<vmem>>, vector<8x3xf32>
    tpu.vector_store %arg5[%c0_11, %c0_12], %12 {strides = array<i32>} : memref<8x3xf32, #tpu.memory_space<vmem>>, vector<8x3xf32>,
    return
  }
}

</mosaic_0001>

<bundles_post_ra>
// kernel: tpu_custom_call.1
= control target key start
LH: loop header
LB: loop body
LE: loop exit
PB: predicated region body
PF: predicated region fallthrough
CT: control target
= control target key end

     0   :  { %vm33_vm0 = vcmask 1043456   ;;  %vm29_vm1 = vcmask 31744   ;;  %v229_v0 = vmov 0.0   ;;  %vm230_vm2 = vmmov 0   ;;  %s288_s1 = inlined_call_operand.vmem [shape: f32[4,32], index: 1, kind: input, shape index: {}]   ;;  %s289_s0 = inlined_call_operand.vmem [shape: f32[8,4], index: 0, kind: input, shape index: {}]   ;;  %s290_s3 = inlined_call_operand.vmem [shape: f32[32,3], index: 3, kind: input, shape index: {}]   ;;  %s291_s2 = inlined_call_operand.vmem [shape: f32[1,32], index: 2, kind: input, shape index: {}]   ;;  %s292_s4 = inlined_call_operand.vmem [shape: f32[1,3], index: 4, kind: input, shape index: {}]   ;;  %s293_s5 = inlined_call_operand.vmem [shape: f32[8,3], index: 5, kind: output, shape index: {}]  }
   0x1   :  { %211 = vmatprep.subr.mxu0 %v229_v0  ;;  %v21_v1 = vld [vmem:[%s288_s1] sm:$0xf]  ;;  %213 = vmatprep.mubr.msk.f32.mxu0 %vm230_vm2, %v229_v0  ;;  %v111_v3 = vld [vmem:[%s290_s3 + $0x18] sm:$0xff]  ;;  %v110_v4 = vld [vmem:[%s290_s3 + $0x10] sm:$0xff]  ;;  %vm119_vm3 = vcmask 261120   ;;  %vm193_vm4 = vcmask 23552  }
   0x2   :  { %v20_v2 = vld [vmem:[%s289_s0] sm:$0xff]  ;;  %212 = vmatpush3.msk.msra.mxu0 %vm33_vm0, %v21_v1  ;;  %216 = vmatprep.subr.mxu1 %v229_v0  ;;  %v109_v5 = vld [vmem:[%s290_s3 + $0x8] sm:$0xff] }
   0x3   :  { %214 = vmatmul.mubr.msk.f32.vlgmr.msra.gmra.mxu0 %vm29_vm1, %v20_v2  ;;  %217 = vmatpush3.msra.mxu1 %v111_v3  ;;  %v108_v6 = vld [vmem:[%s290_s3] sm:$0xff] }
   0x4   :  { %218 = vmatprep.subr.mxu1 %v229_v0  ;;  %224 = vmatprep.mubr.msk.f32.mxu1 %vm230_vm2, %v229_v0  ;;  %v199_v7 = vld [vmem:[%s291_s2] ss:$0 sm:$0xff] }
   0x5   :  { %219 = vmatpush3.msra.mxu1 %v110_v4  ;;  %v202_v12 = vld [vmem:[%s292_s4] ss:$0 sm:$0xff] }
   0x6   :  { %220 = vmatprep.subr.mxu1 %v229_v0 }
   0x7   :  { %221 = vmatpush3.msra.mxu1 %v109_v5 }
   0x8   :  { %222 = vmatprep.subr.mxu1 %v229_v0 }
   0x9   :  { %223 = vmatpush3.msra.mxu1 %v108_v6 }
  0xc3   :  { %v103_v8 = vpop.f32.mrf.mxu0 }
  0xc4   :  { %v104_v9 = vadd.f32 %v199_v7, %v103_v8 }
  0xc5   :  { %v215_v10 = vpop.f32.mrf.mxu0 }
  0xc6   :  { %v107_v11 = vmax.f32 %v104_v9, 0.0 }
  0xc8   :  { %225 = vmatmul.mubr.msk.f32.vlgmr.msra.gmra.mxu1 %vm119_vm3, %v107_v11 }
 0x188   :  { %v189_v13 = vpop.f32.mrf.mxu1 }
 0x189   :  { %v190_v14 = vadd.f32 %v202_v12, %v189_v13 }
 0x18a   :  { %v226_v15 = vpop.f32.mrf.mxu1 }
 0x18b   :  { %194 = vst.msk [vmem:[%s293_s5] sm:$0xff] %vm193_vm4, %v190_v14 }

</bundles_post_ra>
